<compile_context>
chip_gen: v7x
topology: tpu7x:2x2x1
jax: 0.10.0
libtpu: 0.0.40
codegen_flags: <defaults>
</compile_context>

<pallas_src>
import jax
import jax.numpy as jnp
from jax.experimental import pallas as pl
from jax.experimental.pallas import tpu as pltpu

OUT_LANES = 128  # lane-dense merged output width (h | logits | zero pad)


def lstm1_kernel(tok_ref, wembih_ref, whh_ref, b_ref, wfc_ref, bfc_ref, out_ref):
    B, OUT = out_ref.shape
    TB = tok_ref.shape[0]
    T = TB // B
    V = wembih_ref.shape[0]
    H = whh_ref.shape[0]
    C = wfc_ref.shape[1]

    # ---- Fused embedding lookup + input projection (folded offline): ----------
    #   xw = one_hot(tokens) @ (emb @ W_ih) + bias     -> (T*B, 4H)
    tok = tok_ref[...]                                            # (T*B, 1) int32
    iota_v = jax.lax.broadcasted_iota(jnp.int32, (TB, V), 1)      # (T*B, V)
    onehot = (iota_v == tok).astype(jnp.float32)                  # (T*B, V)
    xw = (jnp.dot(onehot, wembih_ref[...],
                  preferred_element_type=jnp.float32)
          + b_ref[...])                                           # (T*B, 4H)

    whh = whh_ref[...]                                            # (H, 4H)

    # ---- Recurrence: fully unrolled, h/c carried as values (vregs) -------------
    # g-gate columns of W_embih / W_hh / bias are pre-scaled by 2 in the wrapper,
    # so a SINGLE sigmoid pass covers all gates:  tanh(x) = 2*sigmoid(2x) - 1.
    h = jnp.zeros((B, H), jnp.float32)
    c = jnp.zeros((B, H), jnp.float32)
    for t in range(T):                                            # static T -> unrolled
        gates = xw[t * B:(t + 1) * B, :] + jnp.dot(
            h, whh, preferred_element_type=jnp.float32)           # (B, 4H)
        sig = jax.nn.sigmoid(gates)                               # one EUP pass
        i_g = sig[:, 0 * H:1 * H]
        f_g = sig[:, 1 * H:2 * H]
        g_g = 2.0 * sig[:, 2 * H:3 * H] - 1.0                     # tanh via identity
        o_g = sig[:, 3 * H:4 * H]
        c = f_g * c + i_g * g_g
        h = o_g * jnp.tanh(c)

    # ---- Outputs: single lane-dense (B, 128) block --------------------------
    # lanes [0:H) = last hidden state, lanes [H:H+C) = fc1 logits, rest zero.
    logits = (jnp.dot(h, wfc_ref[...], preferred_element_type=jnp.float32)
              + bfc_ref[...])                                     # (B, C)
    out_ref[...] = jnp.zeros((B, OUT), jnp.float32)
    out_ref[:, 0:H] = h
    out_ref[:, H:H + C] = logits


def lstm1_forward(tokens, params):
    """tokens: (B, T) int32.  Returns (out[:, -1, :], fc1(out[:, -1, :]))."""
    emb_table = params["emb"]            # (V, E), row padding_index is zero
    w_ih = params["w_ih"]                # (E, 4H)
    w_hh = params["w_hh"]                # (H, 4H)
    bias = params["bias"]                # (1, 4H) = b_ih + b_hh
    w_fc = params["w_fc"]                # (H, C)
    b_fc = params["b_fc"]                # (1, C)

    B, T = tokens.shape
    H = w_hh.shape[0]
    C = w_fc.shape[1]
    assert H + C <= OUT_LANES

    # ---- One-time parameter prep (tiny XLA ops outside the kernel) -------------
    # Fold embedding into input projection: (V, E) @ (E, 4H) -> (V, 4H).
    w_embih = jnp.dot(emb_table, w_ih, precision=jax.lax.Precision.HIGHEST)
    # Pre-scale ONLY the g-gate columns (2H:3H) by 2 for the 2*sigmoid(2x)-1 trick.
    col_scale = jnp.concatenate([jnp.ones((2 * H,), jnp.float32),
                                 jnp.full((H,), 2.0, jnp.float32),
                                 jnp.ones((H,), jnp.float32)])[None, :]   # (1, 4H)
    w_embih = w_embih * col_scale
    w_hh_s = w_hh * col_scale
    bias_s = bias * col_scale

    # Tiny int glue only: time-major flatten of the token ids (T*B int32s).
    tok_tm = jnp.transpose(tokens, (1, 0)).reshape(T * B, 1).astype(jnp.int32)

    vmem = pltpu.MemorySpace.VMEM
    out128 = pl.pallas_call(
        lstm1_kernel,
        out_shape=jax.ShapeDtypeStruct((B, OUT_LANES), jnp.float32),
        # Single invocation (no grid): every operand is a one-shot whole-array
        # DMA into VMEM; no pipeline double-buffering of invariant inputs.
        in_specs=[pl.BlockSpec(memory_space=vmem)] * 6,
        out_specs=pl.BlockSpec(memory_space=vmem),
    )(tok_tm, w_embih, w_hh_s, bias_s, w_fc, b_fc)

    out_last = out128[:, :H]
    h1 = out128[:, H:H + C]
    return out_last, h1


def lstm1_reference(tokens, params):
    """Pure-JAX reference matching PyTorch LSTM semantics."""
    emb_table = params["emb"]
    x_emb = jnp.take(emb_table, tokens, axis=0)           # (B, T, E)
    B, T, E = x_emb.shape
    H = params["w_hh"].shape[0]

    def step(carry, x_t):
        h, c = carry
        gates = x_t @ params["w_ih"] + h @ params["w_hh"] + params["bias"][0]
        i_g = jax.nn.sigmoid(gates[:, 0 * H:1 * H])
        f_g = jax.nn.sigmoid(gates[:, 1 * H:2 * H])
        g_g = jnp.tanh(gates[:, 2 * H:3 * H])
        o_g = jax.nn.sigmoid(gates[:, 3 * H:4 * H])
        c = f_g * c + i_g * g_g
        h = o_g * jnp.tanh(c)
        return (h, c), h

    h0 = jnp.zeros((B, H), jnp.float32)
    c0 = jnp.zeros((B, H), jnp.float32)
    (h_last, _), _ = jax.lax.scan(step, (h0, c0),
                                  jnp.transpose(x_emb, (1, 0, 2)))
    h1 = h_last @ params["w_fc"] + params["b_fc"][0]
    return h_last, h1


def make_params(key, vocab_size, embed_dim, hidden_size, num_class,
                padding_index=0):
    ks = jax.random.split(key, 7)
    scale = 0.1
    emb = scale * jax.random.normal(ks[0], (vocab_size, embed_dim), jnp.float32)
    emb = emb.at[padding_index].set(0.0)                  # padding_idx row = 0
    w_ih = scale * jax.random.normal(ks[1], (embed_dim, 4 * hidden_size), jnp.float32)
    w_hh = scale * jax.random.normal(ks[2], (hidden_size, 4 * hidden_size), jnp.float32)
    b_ih = scale * jax.random.normal(ks[3], (4 * hidden_size,), jnp.float32)
    b_hh = scale * jax.random.normal(ks[4], (4 * hidden_size,), jnp.float32)
    w_fc = scale * jax.random.normal(ks[5], (hidden_size, num_class), jnp.float32)
    b_fc = scale * jax.random.normal(ks[6], (num_class,), jnp.float32)
    return {
        "emb": emb,
        "w_ih": w_ih,
        "w_hh": w_hh,
        "bias": (b_ih + b_hh).reshape(1, -1),
        "w_fc": w_fc,
        "b_fc": b_fc.reshape(1, -1),
    }


if __name__ == "__main__":
    VOCAB, EMBED, HIDDEN, NUM_CLASS = 50, 32, 32, 8
    B, T = 8, 8

    key = jax.random.PRNGKey(0)
    k_tok, k_par = jax.random.split(key)
    params = make_params(k_par, VOCAB, EMBED, HIDDEN, NUM_CLASS)
    tokens = jax.random.randint(k_tok, (B, T), 0, VOCAB, dtype=jnp.int32)

    out_last, h1 = jax.jit(lstm1_forward)(tokens, params)
    jax.block_until_ready((out_last, h1))

    ref_out, ref_h1 = lstm1_reference(tokens, params)
    # Tolerance slightly relaxed vs. 1e-5: the offline emb@W_ih fold and the
    # tanh(x) = 2*sigmoid(2x)-1 identity change the op sequence (different
    # transcendental approximations / reduction order), but the math is identical.
    assert jnp.allclose(out_last, ref_out, atol=1e-4, rtol=1e-4)
    assert jnp.allclose(h1, ref_h1, atol=1e-4, rtol=1e-4)

    print("KERNEL_OK")
</pallas_src>

<mosaic_0001>
module attributes {stable_mosaic.version = 11 : i64} {
  func.func @lstm1_kernel(%arg0: memref<64x1xi32, #tpu.memory_space<vmem>>, %arg1: memref<50x128xf32, #tpu.memory_space<vmem>>, %arg2: memref<32x128xf32, #tpu.memory_space<vmem>>, %arg3: memref<1x128xf32, #tpu.memory_space<vmem>>, %arg4: memref<32x8xf32, #tpu.memory_space<vmem>>, %arg5: memref<1x8xf32, #tpu.memory_space<vmem>>, %arg6: memref<8x128xf32, #tpu.memory_space<vmem>>) attributes {dimension_semantics = [], scalar_prefetch = 0 : i64, scratch_operands = 0 : i64, tpu.core_type = #tpu.core_type<tc>} {
    %c0 = arith.constant 0 : index
    %c0_0 = arith.constant 0 : index
    %0 = vector.load %arg0[%c0, %c0_0] : memref<64x1xi32, #tpu.memory_space<vmem>>, vector<64x1xi32>
    %1 = tpu.iota {dimensions = array<i32: 1>} : vector<64x50xi32>
    %2 = vector.broadcast %0 : vector<64x1xi32> to vector<64x50xi32>
    %3 = arith.cmpi eq, %1, %2 : vector<64x50xi32>
    %4 = arith.extui %3 : vector<64x50xi1> to vector<64x50xi32>
    %5 = arith.sitofp %4 : vector<64x50xi32> to vector<64x50xf32>
    %c0_1 = arith.constant 0 : index
    %c0_2 = arith.constant 0 : index
    %6 = vector.load %arg1[%c0_1, %c0_2] : memref<50x128xf32, #tpu.memory_space<vmem>>, vector<50x128xf32>
    %cst = arith.constant dense<0.000000e+00> : vector<64x128xf32>
    %7 = tpu.matmul %5, %6, %cst {dimension_numbers = #tpu.dot_dimension_numbers<[1], [0], [0], [1], [0, 0, 1, 1], [], []>} : vector<64x50xf32>, vector<50x128xf32>, vector<64x128xf32> -> vector<64x128xf32>
    %c0_3 = arith.constant 0 : index
    %c0_4 = arith.constant 0 : index
    %8 = vector.load %arg3[%c0_3, %c0_4] : memref<1x128xf32, #tpu.memory_space<vmem>>, vector<1x128xf32>
    %9 = vector.broadcast %8 : vector<1x128xf32> to vector<64x128xf32>
    %10 = arith.addf %7, %9 : vector<64x128xf32>
    %c0_5 = arith.constant 0 : index
    %c0_6 = arith.constant 0 : index
    %11 = vector.load %arg2[%c0_5, %c0_6] : memref<32x128xf32, #tpu.memory_space<vmem>>, vector<32x128xf32>
    %cst_7 = arith.constant 0.000000e+00 : f32
    %12 = vector.broadcast %cst_7 : f32 to vector<8x32xf32>
    %cst_8 = arith.constant 0.000000e+00 : f32
    %13 = vector.broadcast %cst_8 : f32 to vector<8x32xf32>
    %14 = vector.extract_strided_slice %10 {offsets = [0, 0], sizes = [8, 128], strides = [1, 1]} : vector<64x128xf32> to vector<8x128xf32>
    %cst_9 = arith.constant dense<0.000000e+00> : vector<8x128xf32>
    %15 = tpu.matmul %12, %11, %cst_9 {dimension_numbers = #tpu.dot_dimension_numbers<[1], [0], [0], [1], [0, 0, 1, 1], [], []>} : vector<8x32xf32>, vector<32x128xf32>, vector<8x128xf32> -> vector<8x128xf32>
    %16 = arith.addf %14, %15 : vector<8x128xf32>
    %17 = arith.negf %16 : vector<8x128xf32>
    %18 = math.exp %17 : vector<8x128xf32>
    %cst_10 = arith.constant 1.000000e+00 : f32
    %19 = vector.broadcast %cst_10 : f32 to vector<8x128xf32>
    %20 = arith.addf %19, %18 : vector<8x128xf32>
    %21 = arith.divf %19, %20 : vector<8x128xf32>
    %22 = vector.extract_strided_slice %21 {offsets = [0, 0], sizes = [8, 32], strides = [1, 1]} : vector<8x128xf32> to vector<8x32xf32>
    %23 = vector.extract_strided_slice %21 {offsets = [0, 32], sizes = [8, 32], strides = [1, 1]} : vector<8x128xf32> to vector<8x32xf32>
    %24 = vector.extract_strided_slice %21 {offsets = [0, 64], sizes = [8, 32], strides = [1, 1]} : vector<8x128xf32> to vector<8x32xf32>
    %cst_11 = arith.constant 2.000000e+00 : f32
    %25 = vector.broadcast %cst_11 : f32 to vector<8x32xf32>
    %26 = arith.mulf %25, %24 : vector<8x32xf32>
    %cst_12 = arith.constant 1.000000e+00 : f32
    %27 = vector.broadcast %cst_12 : f32 to vector<8x32xf32>
    %28 = arith.subf %26, %27 : vector<8x32xf32>
    %29 = vector.extract_strided_slice %21 {offsets = [0, 96], sizes = [8, 32], strides = [1, 1]} : vector<8x128xf32> to vector<8x32xf32>
    %30 = arith.mulf %23, %13 : vector<8x32xf32>
    %31 = arith.mulf %22, %28 : vector<8x32xf32>
    %32 = arith.addf %30, %31 : vector<8x32xf32>
    %33 = math.tanh %32 : vector<8x32xf32>
    %34 = arith.mulf %29, %33 : vector<8x32xf32>
    %35 = vector.extract_strided_slice %10 {offsets = [8, 0], sizes = [8, 128], strides = [1, 1]} : vector<64x128xf32> to vector<8x128xf32>
    %cst_13 = arith.constant dense<0.000000e+00> : vector<8x128xf32>
    %36 = tpu.matmul %34, %11, %cst_13 {dimension_numbers = #tpu.dot_dimension_numbers<[1], [0], [0], [1], [0, 0, 1, 1], [], []>} : vector<8x32xf32>, vector<32x128xf32>, vector<8x128xf32> -> vector<8x128xf32>
    %37 = arith.addf %35, %36 : vector<8x128xf32>
    %38 = arith.negf %37 : vector<8x128xf32>
    %39 = math.exp %38 : vector<8x128xf32>
    %cst_14 = arith.constant 1.000000e+00 : f32
    %40 = vector.broadcast %cst_14 : f32 to vector<8x128xf32>
    %41 = arith.addf %40, %39 : vector<8x128xf32>
    %42 = arith.divf %40, %41 : vector<8x128xf32>
    %43 = vector.extract_strided_slice %42 {offsets = [0, 0], sizes = [8, 32], strides = [1, 1]} : vector<8x128xf32> to vector<8x32xf32>
    %44 = vector.extract_strided_slice %42 {offsets = [0, 32], sizes = [8, 32], strides = [1, 1]} : vector<8x128xf32> to vector<8x32xf32>
    %45 = vector.extract_strided_slice %42 {offsets = [0, 64], sizes = [8, 32], strides = [1, 1]} : vector<8x128xf32> to vector<8x32xf32>
    %cst_15 = arith.constant 2.000000e+00 : f32
    %46 = vector.broadcast %cst_15 : f32 to vector<8x32xf32>
    %47 = arith.mulf %46, %45 : vector<8x32xf32>
    %cst_16 = arith.constant 1.000000e+00 : f32
    %48 = vector.broadcast %cst_16 : f32 to vector<8x32xf32>
    %49 = arith.subf %47, %48 : vector<8x32xf32>
    %50 = vector.extract_strided_slice %42 {offsets = [0, 96], sizes = [8, 32], strides = [1, 1]} : vector<8x128xf32> to vector<8x32xf32>
    %51 = arith.mulf %44, %32 : vector<8x32xf32>
    %52 = arith.mulf %43, %49 : vector<8x32xf32>
    %53 = arith.addf %51, %52 : vector<8x32xf32>
    %54 = math.tanh %53 : vector<8x32xf32>
    %55 = arith.mulf %50, %54 : vector<8x32xf32>
    %56 = vector.extract_strided_slice %10 {offsets = [16, 0], sizes = [8, 128], strides = [1, 1]} : vector<64x128xf32> to vector<8x128xf32>
    %cst_17 = arith.constant dense<0.000000e+00> : vector<8x128xf32>
    %57 = tpu.matmul %55, %11, %cst_17 {dimension_numbers = #tpu.dot_dimension_numbers<[1], [0], [0], [1], [0, 0, 1, 1], [], []>} : vector<8x32xf32>, vector<32x128xf32>, vector<8x128xf32> -> vector<8x128xf32>
    %58 = arith.addf %56, %57 : vector<8x128xf32>
    %59 = arith.negf %58 : vector<8x128xf32>
    %60 = math.exp %59 : vector<8x128xf32>
    %cst_18 = arith.constant 1.000000e+00 : f32
    %61 = vector.broadcast %cst_18 : f32 to vector<8x128xf32>
    %62 = arith.addf %61, %60 : vector<8x128xf32>
    %63 = arith.divf %61, %62 : vector<8x128xf32>
    %64 = vector.extract_strided_slice %63 {offsets = [0, 0], sizes = [8, 32], strides = [1, 1]} : vector<8x128xf32> to vector<8x32xf32>
    %65 = vector.extract_strided_slice %63 {offsets = [0, 32], sizes = [8, 32], strides = [1, 1]} : vector<8x128xf32> to vector<8x32xf32>
    %66 = vector.extract_strided_slice %63 {offsets = [0, 64], sizes = [8, 32], strides = [1, 1]} : vector<8x128xf32> to vector<8x32xf32>
    %cst_19 = arith.constant 2.000000e+00 : f32
    %67 = vector.broadcast %cst_19 : f32 to vector<8x32xf32>
    %68 = arith.mulf %67, %66 : vector<8x32xf32>
    %cst_20 = arith.constant 1.000000e+00 : f32
    %69 = vector.broadcast %cst_20 : f32 to vector<8x32xf32>
    %70 = arith.subf %68, %69 : vector<8x32xf32>
    %71 = vector.extract_strided_slice %63 {offsets = [0, 96], sizes = [8, 32], strides = [1, 1]} : vector<8x128xf32> to vector<8x32xf32>
    %72 = arith.mulf %65, %53 : vector<8x32xf32>
    %73 = arith.mulf %64, %70 : vector<8x32xf32>
    %74 = arith.addf %72, %73 : vector<8x32xf32>
    %75 = math.tanh %74 : vector<8x32xf32>
    %76 = arith.mulf %71, %75 : vector<8x32xf32>
    %77 = vector.extract_strided_slice %10 {offsets = [24, 0], sizes = [8, 128], strides = [1, 1]} : vector<64x128xf32> to vector<8x128xf32>
    %cst_21 = arith.constant dense<0.000000e+00> : vector<8x128xf32>
    %78 = tpu.matmul %76, %11, %cst_21 {dimension_numbers = #tpu.dot_dimension_numbers<[1], [0], [0], [1], [0, 0, 1, 1], [], []>} : vector<8x32xf32>, vector<32x128xf32>, vector<8x128xf32> -> vector<8x128xf32>
    %79 = arith.addf %77, %78 : vector<8x128xf32>
    %80 = arith.negf %79 : vector<8x128xf32>
    %81 = math.exp %80 : vector<8x128xf32>
    %cst_22 = arith.constant 1.000000e+00 : f32
    %82 = vector.broadcast %cst_22 : f32 to vector<8x128xf32>
    %83 = arith.addf %82, %81 : vector<8x128xf32>
    %84 = arith.divf %82, %83 : vector<8x128xf32>
    %85 = vector.extract_strided_slice %84 {offsets = [0, 0], sizes = [8, 32], strides = [1, 1]} : vector<8x128xf32> to vector<8x32xf32>
    %86 = vector.extract_strided_slice %84 {offsets = [0, 32], sizes = [8, 32], strides = [1, 1]} : vector<8x128xf32> to vector<8x32xf32>
    %87 = vector.extract_strided_slice %84 {offsets = [0, 64], sizes = [8, 32], strides = [1, 1]} : vector<8x128xf32> to vector<8x32xf32>
    %cst_23 = arith.constant 2.000000e+00 : f32
    %88 = vector.broadcast %cst_23 : f32 to vector<8x32xf32>
    %89 = arith.mulf %88, %87 : vector<8x32xf32>
    %cst_24 = arith.constant 1.000000e+00 : f32
    %90 = vector.broadcast %cst_24 : f32 to vector<8x32xf32>
    %91 = arith.subf %89, %90 : vector<8x32xf32>
    %92 = vector.extract_strided_slice %84 {offsets = [0, 96], sizes = [8, 32], strides = [1, 1]} : vector<8x128xf32> to vector<8x32xf32>
    %93 = arith.mulf %86, %74 : vector<8x32xf32>
    %94 = arith.mulf %85, %91 : vector<8x32xf32>
    %95 = arith.addf %93, %94 : vector<8x32xf32>
    %96 = math.tanh %95 : vector<8x32xf32>
    %97 = arith.mulf %92, %96 : vector<8x32xf32>
    %98 = vector.extract_strided_slice %10 {offsets = [32, 0], sizes = [8, 128], strides = [1, 1]} : vector<64x128xf32> to vector<8x128xf32>
    %cst_25 = arith.constant dense<0.000000e+00> : vector<8x128xf32>
    %99 = tpu.matmul %97, %11, %cst_25 {dimension_numbers = #tpu.dot_dimension_numbers<[1], [0], [0], [1], [0, 0, 1, 1], [], []>} : vector<8x32xf32>, vector<32x128xf32>, vector<8x128xf32> -> vector<8x128xf32>
    %100 = arith.addf %98, %99 : vector<8x128xf32>
    %101 = arith.negf %100 : vector<8x128xf32>
    %102 = math.exp %101 : vector<8x128xf32>
    %cst_26 = arith.constant 1.000000e+00 : f32
    %103 = vector.broadcast %cst_26 : f32 to vector<8x128xf32>
    %104 = arith.addf %103, %102 : vector<8x128xf32>
    %105 = arith.divf %103, %104 : vector<8x128xf32>
    %106 = vector.extract_strided_slice %105 {offsets = [0, 0], sizes = [8, 32], strides = [1, 1]} : vector<8x128xf32> to vector<8x32xf32>
    %107 = vector.extract_strided_slice %105 {offsets = [0, 32], sizes = [8, 32], strides = [1, 1]} : vector<8x128xf32> to vector<8x32xf32>
    %108 = vector.extract_strided_slice %105 {offsets = [0, 64], sizes = [8, 32], strides = [1, 1]} : vector<8x128xf32> to vector<8x32xf32>
    %cst_27 = arith.constant 2.000000e+00 : f32
    %109 = vector.broadcast %cst_27 : f32 to vector<8x32xf32>
    %110 = arith.mulf %109, %108 : vector<8x32xf32>
    %cst_28 = arith.constant 1.000000e+00 : f32
    %111 = vector.broadcast %cst_28 : f32 to vector<8x32xf32>
    %112 = arith.subf %110, %111 : vector<8x32xf32>
    %113 = vector.extract_strided_slice %105 {offsets = [0, 96], sizes = [8, 32], strides = [1, 1]} : vector<8x128xf32> to vector<8x32xf32>
    %114 = arith.mulf %107, %95 : vector<8x32xf32>
    %115 = arith.mulf %106, %112 : vector<8x32xf32>
    %116 = arith.addf %114, %115 : vector<8x32xf32>
    %117 = math.tanh %116 : vector<8x32xf32>
    %118 = arith.mulf %113, %117 : vector<8x32xf32>
    %119 = vector.extract_strided_slice %10 {offsets = [40, 0], sizes = [8, 128], strides = [1, 1]} : vector<64x128xf32> to vector<8x128xf32>
    %cst_29 = arith.constant dense<0.000000e+00> : vector<8x128xf32>
    %120 = tpu.matmul %118, %11, %cst_29 {dimension_numbers = #tpu.dot_dimension_numbers<[1], [0], [0], [1], [0, 0, 1, 1], [], []>} : vector<8x32xf32>, vector<32x128xf32>, vector<8x128xf32> -> vector<8x128xf32>
    %121 = arith.addf %119, %120 : vector<8x128xf32>
    %122 = arith.negf %121 : vector<8x128xf32>
    %123 = math.exp %122 : vector<8x128xf32>
    %cst_30 = arith.constant 1.000000e+00 : f32
    %124 = vector.broadcast %cst_30 : f32 to vector<8x128xf32>
    %125 = arith.addf %124, %123 : vector<8x128xf32>
    %126 = arith.divf %124, %125 : vector<8x128xf32>
    %127 = vector.extract_strided_slice %126 {offsets = [0, 0], sizes = [8, 32], strides = [1, 1]} : vector<8x128xf32> to vector<8x32xf32>
    %128 = vector.extract_strided_slice %126 {offsets = [0, 32], sizes = [8, 32], strides = [1, 1]} : vector<8x128xf32> to vector<8x32xf32>
    %129 = vector.extract_strided_slice %126 {offsets = [0, 64], sizes = [8, 32], strides = [1, 1]} : vector<8x128xf32> to vector<8x32xf32>
    %cst_31 = arith.constant 2.000000e+00 : f32
    %130 = vector.broadcast %cst_31 : f32 to vector<8x32xf32>
    %131 = arith.mulf %130, %129 : vector<8x32xf32>
    %cst_32 = arith.constant 1.000000e+00 : f32
    %132 = vector.broadcast %cst_32 : f32 to vector<8x32xf32>
    %133 = arith.subf %131, %132 : vector<8x32xf32>
    %134 = vector.extract_strided_slice %126 {offsets = [0, 96], sizes = [8, 32], strides = [1, 1]} : vector<8x128xf32> to vector<8x32xf32>
    %135 = arith.mulf %128, %116 : vector<8x32xf32>
    %136 = arith.mulf %127, %133 : vector<8x32xf32>
    %137 = arith.addf %135, %136 : vector<8x32xf32>
    %138 = math.tanh %137 : vector<8x32xf32>
    %139 = arith.mulf %134, %138 : vector<8x32xf32>
    %140 = vector.extract_strided_slice %10 {offsets = [48, 0], sizes = [8, 128], strides = [1, 1]} : vector<64x128xf32> to vector<8x128xf32>
    %cst_33 = arith.constant dense<0.000000e+00> : vector<8x128xf32>
    %141 = tpu.matmul %139, %11, %cst_33 {dimension_numbers = #tpu.dot_dimension_numbers<[1], [0], [0], [1], [0, 0, 1, 1], [], []>} : vector<8x32xf32>, vector<32x128xf32>, vector<8x128xf32> -> vector<8x128xf32>
    %142 = arith.addf %140, %141 : vector<8x128xf32>
    %143 = arith.negf %142 : vector<8x128xf32>
    %144 = math.exp %143 : vector<8x128xf32>
    %cst_34 = arith.constant 1.000000e+00 : f32
    %145 = vector.broadcast %cst_34 : f32 to vector<8x128xf32>
    %146 = arith.addf %145, %144 : vector<8x128xf32>
    %147 = arith.divf %145, %146 : vector<8x128xf32>
    %148 = vector.extract_strided_slice %147 {offsets = [0, 0], sizes = [8, 32], strides = [1, 1]} : vector<8x128xf32> to vector<8x32xf32>
    %149 = vector.extract_strided_slice %147 {offsets = [0, 32], sizes = [8, 32], strides = [1, 1]} : vector<8x128xf32> to vector<8x32xf32>
    %150 = vector.extract_strided_slice %147 {offsets = [0, 64], sizes = [8, 32], strides = [1, 1]} : vector<8x128xf32> to vector<8x32xf32>
    %cst_35 = arith.constant 2.000000e+00 : f32
    %151 = vector.broadcast %cst_35 : f32 to vector<8x32xf32>
    %152 = arith.mulf %151, %150 : vector<8x32xf32>
    %cst_36 = arith.constant 1.000000e+00 : f32
    %153 = vector.broadcast %cst_36 : f32 to vector<8x32xf32>
    %154 = arith.subf %152, %153 : vector<8x32xf32>
    %155 = vector.extract_strided_slice %147 {offsets = [0, 96], sizes = [8, 32], strides = [1, 1]} : vector<8x128xf32> to vector<8x32xf32>
    %156 = arith.mulf %149, %137 : vector<8x32xf32>
    %157 = arith.mulf %148, %154 : vector<8x32xf32>
    %158 = arith.addf %156, %157 : vector<8x32xf32>
    %159 = math.tanh %158 : vector<8x32xf32>
    %160 = arith.mulf %155, %159 : vector<8x32xf32>
    %161 = vector.extract_strided_slice %10 {offsets = [56, 0], sizes = [8, 128], strides = [1, 1]} : vector<64x128xf32> to vector<8x128xf32>
    %cst_37 = arith.constant dense<0.000000e+00> : vector<8x128xf32>
    %162 = tpu.matmul %160, %11, %cst_37 {dimension_numbers = #tpu.dot_dimension_numbers<[1], [0], [0], [1], [0, 0, 1, 1], [], []>} : vector<8x32xf32>, vector<32x128xf32>, vector<8x128xf32> -> vector<8x128xf32>
    %163 = arith.addf %161, %162 : vector<8x128xf32>
    %164 = arith.negf %163 : vector<8x128xf32>
    %165 = math.exp %164 : vector<8x128xf32>
    %cst_38 = arith.constant 1.000000e+00 : f32
    %166 = vector.broadcast %cst_38 : f32 to vector<8x128xf32>
    %167 = arith.addf %166, %165 : vector<8x128xf32>
    %168 = arith.divf %166, %167 : vector<8x128xf32>
    %169 = vector.extract_strided_slice %168 {offsets = [0, 0], sizes = [8, 32], strides = [1, 1]} : vector<8x128xf32> to vector<8x32xf32>
    %170 = vector.extract_strided_slice %168 {offsets = [0, 32], sizes = [8, 32], strides = [1, 1]} : vector<8x128xf32> to vector<8x32xf32>
    %171 = vector.extract_strided_slice %168 {offsets = [0, 64], sizes = [8, 32], strides = [1, 1]} : vector<8x128xf32> to vector<8x32xf32>
    %cst_39 = arith.constant 2.000000e+00 : f32
    %172 = vector.broadcast %cst_39 : f32 to vector<8x32xf32>
    %173 = arith.mulf %172, %171 : vector<8x32xf32>
    %cst_40 = arith.constant 1.000000e+00 : f32
    %174 = vector.broadcast %cst_40 : f32 to vector<8x32xf32>
    %175 = arith.subf %173, %174 : vector<8x32xf32>
    %176 = vector.extract_strided_slice %168 {offsets = [0, 96], sizes = [8, 32], strides = [1, 1]} : vector<8x128xf32> to vector<8x32xf32>
    %177 = arith.mulf %170, %158 : vector<8x32xf32>
    %178 = arith.mulf %169, %175 : vector<8x32xf32>
    %179 = arith.addf %177, %178 : vector<8x32xf32>
    %180 = math.tanh %179 : vector<8x32xf32>
    %181 = arith.mulf %176, %180 : vector<8x32xf32>
    %c0_41 = arith.constant 0 : index
    %c0_42 = arith.constant 0 : index
    %182 = vector.load %arg4[%c0_41, %c0_42] : memref<32x8xf32, #tpu.memory_space<vmem>>, vector<32x8xf32>
    %cst_43 = arith.constant dense<0.000000e+00> : vector<8x8xf32>
    %183 = tpu.matmul %181, %182, %cst_43 {dimension_numbers = #tpu.dot_dimension_numbers<[1], [0], [0], [1], [0, 0, 1, 1], [], []>} : vector<8x32xf32>, vector<32x8xf32>, vector<8x8xf32> -> vector<8x8xf32>
    %c0_44 = arith.constant 0 : index
    %c0_45 = arith.constant 0 : index
    %184 = vector.load %arg5[%c0_44, %c0_45] : memref<1x8xf32, #tpu.memory_space<vmem>>, vector<1x8xf32>
    %185 = vector.broadcast %184 : vector<1x8xf32> to vector<8x8xf32>
    %186 = arith.addf %183, %185 : vector<8x8xf32>
    %cst_46 = arith.constant 0.000000e+00 : f32
    %187 = vector.broadcast %cst_46 : f32 to vector<8x128xf32>
    %c0_47 = arith.constant 0 : index
    %c0_48 = arith.constant 0 : index
    %188 = vector.load %arg6[%c0_47, %c0_48] : memref<8x128xf32, #tpu.memory_space<vmem>>, vector<8x128xf32>
    tpu.vector_store %arg6[%c0_47, %c0_48], %187 {strides = array<i32>} : memref<8x128xf32, #tpu.memory_space<vmem>>, vector<8x128xf32>,
    %c0_49 = arith.constant 0 : index
    %c0_50 = arith.constant 0 : index
    %189 = vector.load %arg6[%c0_49, %c0_50] : memref<8x128xf32, #tpu.memory_space<vmem>>, vector<8x32xf32>
    tpu.vector_store %arg6[%c0_49, %c0_50], %181 {strides = array<i32>} : memref<8x128xf32, #tpu.memory_space<vmem>>, vector<8x32xf32>,
    %c0_51 = arith.constant 0 : index
    %c32 = arith.constant 32 : index
    %190 = vector.load %arg6[%c0_51, %c32] : memref<8x128xf32, #tpu.memory_space<vmem>>, vector<8x8xf32>
    tpu.vector_store %arg6[%c0_51, %c32], %186 {strides = array<i32>} : memref<8x128xf32, #tpu.memory_space<vmem>>, vector<8x8xf32>,
    return
  }
}

</mosaic_0001>

<bundles_post_ra>
// kernel: mul.17
= control target key start
LH: loop header
LB: loop body
LE: loop exit
PB: predicated region body
PF: predicated region fallthrough
CT: control target
= control target key end

     0   :  { %s34_s0 = inlined_call_operand.vmem [shape: f32[1,128], index: 0, kind: input, shape index: {}]   ;;  %s35_s1 = inlined_call_operand.vmem [shape: f32[1,128], index: 1, kind: input, shape index: {}]   ;;  %s36_s2 = inlined_call_operand.vmem [shape: f32[1,128], index: 2, kind: output, shape index: {}]  }
   0x1   :  { %v3_v0 = vld [vmem:[%s34_s0] sm:$0x1] }
   0x2   :  { %v4_v1 = vld [vmem:[%s35_s1] sm:$0x1] }
   0x3   :  { %v7_v2 = vmul.f32 %v4_v1, %v3_v0 }
   0x5   :  { %9 = vst [vmem:[%s36_s2] sm:$0x1] %v7_v2 }

// kernel: lstm1_forward.1
= control target key start
LH: loop header
LB: loop body
LE: loop exit
PB: predicated region body
PF: predicated region fallthrough
CT: control target
= control target key end

     0   :  { %v1489_v0 = vmov 0   ;;  %v1490_v7 = vmov 0.0|0.0   ;;  %vm1491_vm0 = vmmov 0   ;;  %v1492_v19 = vmov 0.0   ;;  %s1493_s23 = smov 64   ;;  %s1762_s0 = inlined_call_operand.vmem [shape: s32[64,1], index: 0, kind: input, shape index: {}]   ;;  %s1763_s1 = inlined_call_operand.vmem [shape: f32[50,128], index: 1, kind: input, shape index: {}]   ;;  %s1764_s2 = inlined_call_operand.vmem [shape: f32[32,128], index: 2, kind: input, shape index: {}]   ;;  %s1765_s3 = inlined_call_operand.vmem [shape: f32[1,128], index: 3, kind: input, shape index: {}]   ;;  %s1766_s4 = inlined_call_operand.vmem [shape: f32[32,8], index: 4, kind: input, shape index: {}]   ;;  %s1767_s6 = inlined_call_operand.vmem [shape: f32[8,128], index: 6, kind: output, shape index: {}]   ;;  %s1768_s5 = inlined_call_operand.vmem [shape: f32[1,8], index: 5, kind: input, shape index: {}]  }
   0x1   :  { %1439 = vset.pattern.permute.xlu0 %v1489_v0  ;;  %v23_v1 = vld [vmem:[%s1762_s0] sm:$0xff]  ;;  %v24_v2 = vld [vmem:[%s1762_s0 + $0x8] sm:$0xff]  ;;  %1440 = vset.pattern.permute.xlu1 %v1489_v0  ;;  %v83_v5 = vld [vmem:[%s1763_s1 + $0x10] sm:$0xff]  ;;  %vm120_vm1 = vcmask 1041408   ;;  %v31_v21 = vlaneseq  ;;  %vm95_vm2 = vcmask 408576   ;;  %vm233_vm5 = vcmask 261120   ;;  %1126 = vst [vmem:[%s1767_s6] sm:$0xff] %v1492_v19 }
   0x2   :  { %v81_v3 = vld [vmem:[%s1763_s1] sm:$0xff]  ;;  %34 = vperm.xlu0 %1439, %v23_v1   ;;  %v82_v4 = vld [vmem:[%s1763_s1 + $0x8] sm:$0xff]  ;;  %v84_v6 = vld [vmem:[%s1763_s1 + $0x18] sm:$0xff]  ;;  %1379 = vmatprep.subr.bf16.mxu1 %v1490_v7  ;;  %vm1133_vm12 = vcmask 326912  }
   0x3   :  { %v1367_v8 = vpack.c.bf16 %v82_v4, %v81_v3  ;;  %v1371_v9 = vpack.c.bf16 %v84_v6, %v83_v5  ;;  %v85_v10 = vld [vmem:[%s1763_s1 + $0x20] sm:$0xff]  ;;  %v86_v11 = vld [vmem:[%s1763_s1 + $0x28] sm:$0xff]  ;;  %v231_v14 = vld [vmem:[%s1764_s2 + $0x10] sm:$0xff]  ;;  %1276 = vmatprep.mubr.msk.f32.mxu1 %vm1491_vm0, %v1492_v19  ;;  %v1588_v22 = vand.u32 127, %v31_v21 }
   0x4   :  { %v229_v12 = vld [vmem:[%s1764_s2] sm:$0xff]  ;;  %v230_v13 = vld [vmem:[%s1764_s2 + $0x8] sm:$0xff]  ;;  %v232_v15 = vld [vmem:[%s1764_s2 + $0x18] sm:$0xff]  ;;  %v1375_v17 = vpack.c.bf16 %v86_v11, %v85_v10 }
   0x5   :  { %1368 = vmatprep.subr.bf16.mxu0 %v1367_v8  ;;  %v1567_v16 = vpack.c.bf16 %v230_v13, %v229_v12  ;;  %v1570_v18 = vpack.c.bf16 %v232_v15, %v231_v14  ;;  %v87_v20 = vld [vmem:[%s1763_s1 + $0x30] sm:$0x3]  ;;  %v1603_v29 = vld [vmem:[%s1765_s3] ss:$0 sm:$0xff]  ;;  %s1494_s3 = smov 32  }
   0x6   :  { %37 = vperm.xlu0 %1439, %v24_v2   ;;  %1370 = vmatpush3.bf16.msra.mxu0 %v1367_v8  ;;  %v25_v61 = vld [vmem:[%s1762_s0 + $0x10] sm:$0xff]  ;;  %v26_v2 = vld [vmem:[%s1762_s0 + $0x18] sm:$0xff] }
   0x7   :  { %1372 = vmatprep.subr.bf16.mxu0 %v1371_v9  ;;  %1381 = vmatpush3.bf16.msra.mxu1 %v1567_v16 }
   0x8   :  { %1382 = vmatprep.subr.bf16.mxu1 %v1490_v7 }
   0xa   :  { %1374 = vmatpush3.bf16.msra.mxu0 %v1371_v9 }
   0xb   :  { %1376 = vmatprep.subr.bf16.mxu0 %v1375_v17  ;;  %1384 = vmatpush3.bf16.msra.mxu1 %v1570_v18 }
   0xc   :  { %1385 = vmatprep.subr.bf16.mxu1 %v1490_v7 }
   0xe   :  { %1378 = vmatpush3.bf16.msra.mxu0 %v1375_v17  ;;  %1277 = vmatmul.mubr.f32.vlgmr.msra.gmra.mrb[0].mxu1 %v1492_v19 }
   0xf   :  { %1254 = vmatprep.subr.msk.mxu0 %vm120_vm1, %v87_v20  ;;  %1387 = vmatpush3.bf16.msra.mxu1 %v1567_v16 }
  0x10   :  { %1388 = vmatprep.subr.bf16.mxu1 %v1490_v7  ;;  %1287 = vmatprep.mubr.msk.f32.mxu1 %vm1491_vm0, %v1492_v19 }
  0x12   :  { %1255 = vmatpush3.msk.msra.mxu0 %vm120_vm1, %v87_v20 }
  0x13   :  { %1390 = vmatpush3.bf16.msra.mxu1 %v1570_v18  ;;  %1397 = vmatprep.subr.bf16.mxu0 %v1490_v7 }
  0x14   :  { %1391 = vmatprep.subr.bf16.mxu1 %v1490_v7 }
  0x81   :  { %v35_v23 = vpop.permute.xlu0 %34 }
  0x82   :  { %vm57_vm3 = vcmp.eq.s32.totalorder %v1588_v22, %v35_v23 }
  0x83   :  { %v1139_v24 = vsel %vm57_vm3, 1.0, %v1492_v19 }
  0x84   :  { %1256 = vmatprep.mubr.msk.f32.mxu0 %vm95_vm2, %v1139_v24 }
  0x85   :  { %v38_v25 = vpop.permute.xlu0 %37 }
  0x86   :  { %vm58_vm4 = vcmp.eq.s32.totalorder %v1588_v22, %v38_v25 }
  0x87   :  { %v1140_v26 = vsel %vm58_vm4, 1.0, %v1492_v19 }
  0x88   :  { %1257 = vmatmul.mubr.msk.f32.vlgmr.msra.gmra.mrb[0].mxu0 %vm95_vm2, %v1140_v26 }
  0x89   :  { %1399 = vmatpush3.bf16.msra.mxu0 %v1567_v16 }
  0x8a   :  { %1400 = vmatprep.subr.bf16.mxu0 %v1490_v7 }
  0x8d   :  { %1402 = vmatpush3.bf16.msra.mxu0 %v1570_v18 }
  0x8e   :  { %1409 = vmatprep.subr.bf16.mxu0 %v1490_v7 }
  0xe1   :  { %v303_v27 = vpop.f32.mrb[0].mxu1 }
  0xe2   :  { %v1278_v28 = vpop.f32.mrb[1].mxu1 }
 0x15b   :  { %v1258_v30 = vpop.f32.mrb[0].mxu0 }
 0x15c   :  { %v190_v31 = vpop.f32.mrb[1].mxu0  ;;  %v196_v49 = vadd.f32 %v1258_v30, %v1603_v29  ;;  %v27_v30 = vld [vmem:[%s1762_s0 + $0x20] sm:$0xff] }
 0x15d   :  { %v191_v32 = vadd.f32 %v1603_v29, %v190_v31  ;;  %v29_v31 = vld [vmem:[%s1762_s0 + $0x30] sm:$0xff] }
 0x15f   :  { %v307_v33 = vadd.f32 %v303_v27, %v191_v32 }
 0x161   :  { %v1157_v34 = vmul.f32 -1.442695, %v307_v33 }
 0x163   :  { %1441 = vpow2.f32 %v1157_v34 }
 0x16d   :  { %v1442_v35 = vpop.eup %1441 }
 0x16e   :  { %v311_v36 = vadd.f32 1.0, %v1442_v35 }
 0x170   :  { %1443 = vrcp.f32 %v311_v36  ;;  %v28_v36 = vld [vmem:[%s1762_s0 + $0x28] sm:$0xff] }
 0x17a   :  { %v1444_v37 = vpop.eup %1443 }
 0x17b   :  { %v314_v38 = vmul.f32 2.0, %v1444_v37  ;;  %v316_v42 = vmul.f32 0.0, %v1444_v37 }
 0x17d   :  { %v1158_v39 = vadd.f32 -1.0, %v314_v38 }
 0x17f   :  { %318 = vrot.lane.b32.xlu1 %v1158_v39, %s1493_s23  ;;  %v30_v39 = vld [vmem:[%s1762_s0 + $0x38] sm:$0xff] }
 0x1f1   :  { %v319_v40 = vpop.permute.xlu1 %318 }
 0x1f2   :  { %v321_v41 = vmul.f32 %v1444_v37, %v319_v40 }
 0x1f4   :  { %323 = vrot.lane.b32.xlu1 %v321_v41, %s1494_s3 }
 0x266   :  { %v324_v43 = vpop.permute.xlu1 %323 }
 0x267   :  { %v326_v44 = vadd.f32 %v324_v43, %v316_v42 }
 0x269   :  { %1445 = vtanh.f32 %v326_v44 }
 0x273   :  { %v1446_v45 = vpop.eup %1445 }
 0x274   :  { %329 = vrot.lane.b32.xlu0 %v1446_v45, %s1493_s23 }
 0x2e6   :  { %v330_v46 = vpop.permute.xlu0 %329 }
 0x2e7   :  { %v332_v47 = vmul.f32 %v1444_v37, %v330_v46 }
 0x2e9   :  { %334 = vrot.lane.b32.xlu1 %v332_v47, %s1494_s3 }
 0x35b   :  { %v335_v48 = vpop.permute.xlu1 %334 }
 0x35c   :  { %1288 = vmatmul.mubr.msk.f32.vlgmr.msra.gmra.mrb[2].mxu1 %vm233_vm5, %v335_v48 }
 0x35d   :  { %1393 = vmatpush3.bf16.msra.mxu1 %v1567_v16  ;;  %1298 = vmatprep.mubr.msk.f32.mxu1 %vm1491_vm0, %v1492_v19 }
 0x35e   :  { %1394 = vmatprep.subr.bf16.mxu1 %v1490_v7 }
 0x361   :  { %1396 = vmatpush3.bf16.msra.mxu1 %v1570_v18 }
 0x362   :  { %1403 = vmatprep.subr.bf16.mxu1 %v1490_v7 }
 0x42f   :  { %v404_v50 = vpop.f32.mrb[2].mxu1 }
 0x430   :  { %v408_v51 = vadd.f32 %v404_v50, %v196_v49  ;;  %v1289_v52 = vpop.f32.mrb[3].mxu1 }
 0x432   :  { %v1160_v53 = vmul.f32 -1.442695, %v408_v51 }
 0x434   :  { %1447 = vpow2.f32 %v1160_v53 }
 0x43e   :  { %v1448_v54 = vpop.eup %1447 }
 0x43f   :  { %v412_v55 = vadd.f32 1.0, %v1448_v54 }
 0x441   :  { %1449 = vrcp.f32 %v412_v55 }
 0x44b   :  { %v1450_v56 = vpop.eup %1449 }
 0x44c   :  { %v415_v57 = vmul.f32 2.0, %v1450_v56  ;;  %v417_v62 = vmul.f32 %v1450_v56, %v326_v44 }
 0x44e   :  { %v1161_v58 = vadd.f32 -1.0, %v415_v57 }
 0x450   :  { %419 = vrot.lane.b32.xlu0 %v1161_v58, %s1493_s23 }
 0x4c2   :  { %v420_v59 = vpop.permute.xlu0 %419 }
 0x4c3   :  { %v422_v60 = vmul.f32 %v1450_v56, %v420_v59 }
 0x4c5   :  { %424 = vrot.lane.b32.xlu1 %v422_v60, %s1494_s3 }
 0x4c9   :  { %40 = vperm.xlu1 %1440, %v25_v61  }
 0x537   :  { %v425_v63 = vpop.permute.xlu1 %424 }
 0x538   :  { %v427_v0 = vadd.f32 %v425_v63, %v417_v62 }
 0x53a   :  { %1451 = vtanh.f32 %v427_v0 }
 0x544   :  { %v1452_v1 = vpop.eup %1451 }
 0x545   :  { %430 = vrot.lane.b32.xlu0 %v1452_v1, %s1493_s23 }
 0x548   :  { %v41_v3 = vpop.permute.xlu1 %40 }
 0x549   :  { %43 = vperm.xlu0 %1439, %v26_v2   ;;  %vm59_vm6 = vcmp.eq.s32.totalorder %v1588_v22, %v41_v3 }
 0x54a   :  { %v1141_v4 = vsel %vm59_vm6, 1.0, %v1492_v19 }
 0x54b   :  { %1259 = vmatprep.mubr.msk.f32.mxu0 %vm95_vm2, %v1141_v4 }
 0x5b7   :  { %v431_v5 = vpop.permute.xlu0 %430 }
 0x5b8   :  { %v433_v6 = vmul.f32 %v1450_v56, %v431_v5 }
 0x5ba   :  { %435 = vrot.lane.b32.xlu1 %v433_v6, %s1494_s3 }
 0x5c8   :  { %v44_v8 = vpop.permute.xlu0 %43 }
 0x5c9   :  { %vm60_vm7 = vcmp.eq.s32.totalorder %v1588_v22, %v44_v8 }
 0x5ca   :  { %v1142_v9 = vsel %vm60_vm7, 1.0, %v1492_v19 }
 0x5cb   :  { %1260 = vmatmul.mubr.msk.f32.gmra.mrb[2].mxu0 %vm95_vm2, %v1142_v9 }
 0x62c   :  { %v436_v10 = vpop.permute.xlu1 %435 }
 0x62d   :  { %1299 = vmatmul.mubr.msk.f32.vlgmr.msra.gmra.mrb[4].mxu1 %vm233_vm5, %v436_v10 }
 0x62e   :  { %1405 = vmatpush3.bf16.msra.mxu1 %v1567_v16  ;;  %1320 = vmatprep.mubr.msk.f32.mxu1 %vm1491_vm0, %v1492_v19 }
 0x62f   :  { %1406 = vmatprep.subr.bf16.mxu1 %v1490_v7 }
 0x632   :  { %1408 = vmatpush3.bf16.msra.mxu1 %v1570_v18 }
 0x633   :  { %1415 = vmatprep.subr.bf16.mxu1 %v1490_v7 }
 0x69e   :  { %v1641_v11 = vpop.f32.mrb[2].mxu0 }
 0x69f   :  { %v200_v12 = vpop.f32.mrb[3].mxu0  ;;  %v206_v52 = vadd.f32 %v1641_v11, %v1603_v29 }
 0x6a0   :  { %v201_v13 = vadd.f32 %v1603_v29, %v200_v12 }
 0x700   :  { %v505_v14 = vpop.f32.mrb[4].mxu1 }
 0x701   :  { %v509_v15 = vadd.f32 %v505_v14, %v201_v13  ;;  %v1300_v17 = vpop.f32.mrb[5].mxu1 }
 0x703   :  { %v1163_v20 = vmul.f32 -1.442695, %v509_v15 }
 0x705   :  { %1453 = vpow2.f32 %v1163_v20 }
 0x70f   :  { %v1454_v21 = vpop.eup %1453 }
 0x710   :  { %v513_v23 = vadd.f32 1.0, %v1454_v21 }
 0x712   :  { %1455 = vrcp.f32 %v513_v23 }
 0x71c   :  { %v1456_v24 = vpop.eup %1455 }
 0x71d   :  { %v516_v25 = vmul.f32 2.0, %v1456_v24  ;;  %v518_v32 = vmul.f32 %v1456_v24, %v427_v0 }
 0x71f   :  { %v1164_v26 = vadd.f32 -1.0, %v516_v25 }
 0x721   :  { %520 = vrot.lane.b32.xlu0 %v1164_v26, %s1493_s23 }
 0x793   :  { %v521_v27 = vpop.permute.xlu0 %520 }
 0x794   :  { %v523_v28 = vmul.f32 %v1456_v24, %v521_v27 }
 0x796   :  { %525 = vrot.lane.b32.xlu1 %v523_v28, %s1494_s3 }
 0x79a   :  { %46 = vperm.xlu1 %1440, %v27_v30  }
 0x79e   :  { %52 = vperm.xlu1 %1440, %v29_v31  }
 0x808   :  { %v526_v33 = vpop.permute.xlu1 %525 }
 0x809   :  { %v528_v34 = vadd.f32 %v526_v33, %v518_v32 }
 0x80b   :  { %1457 = vtanh.f32 %v528_v34 }
 0x815   :  { %v1458_v35 = vpop.eup %1457 }
 0x816   :  { %531 = vrot.lane.b32.xlu0 %v1458_v35, %s1493_s23 }
 0x819   :  { %v47_v37 = vpop.permute.xlu1 %46 }
 0x81a   :  { %vm61_vm8 = vcmp.eq.s32.totalorder %v1588_v22, %v47_v37  ;;  %49 = vperm.xlu0 %1439, %v28_v36  }
 0x81b   :  { %v1143_v38 = vsel %vm61_vm8, 1.0, %v1492_v19 }
 0x81c   :  { %1262 = vmatprep.mubr.msk.f32.mxu0 %vm95_vm2, %v1143_v38 }
 0x81d   :  { %v53_v42 = vpop.permute.xlu1 %52 }
 0x81e   :  { %55 = vperm.xlu0 %1439, %v30_v39   ;;  %vm63_vm9 = vcmp.eq.s32.totalorder %v1588_v22, %v53_v42 }
 0x81f   :  { %v1145_v45 = vsel %vm63_vm9, 1.0, %v1492_v19 }
 0x888   :  { %v532_v40 = vpop.permute.xlu0 %531 }
 0x889   :  { %v534_v41 = vmul.f32 %v1456_v24, %v532_v40 }
 0x88b   :  { %536 = vrot.lane.b32.xlu1 %v534_v41, %s1494_s3 }
 0x899   :  { %v50_v43 = vpop.permute.xlu0 %49 }
 0x89a   :  { %vm62_vm10 = vcmp.eq.s32.totalorder %v1588_v22, %v50_v43 }
 0x89b   :  { %v1144_v44 = vsel %vm62_vm10, 1.0, %v1492_v19 }
 0x89c   :  { %1263 = vmatmul.mubr.msk.f32.gmra.mrb[4].mxu0 %vm95_vm2, %v1144_v44 }
 0x89d   :  { %v56_v46 = vpop.permute.xlu0 %55  ;;  %1265 = vmatprep.mubr.msk.f32.mxu0 %vm95_vm2, %v1145_v45 }
 0x89e   :  { %vm64_vm11 = vcmp.eq.s32.totalorder %v1588_v22, %v56_v46 }
 0x89f   :  { %v1146_v47 = vsel %vm64_vm11, 1.0, %v1492_v19 }
 0x8a0   :  { %1266 = vmatmul.mubr.msk.f32.gmra.mrb[6].mxu0 %vm95_vm2, %v1146_v47 }
 0x8a1   :  { %1309 = vmatprep.mubr.msk.f32.mxu0 %vm1491_vm0, %v1492_v19 }
 0x8fd   :  { %v537_v48 = vpop.permute.xlu1 %536 }
 0x8fe   :  { %1310 = vmatmul.mubr.msk.f32.vlgmr.msra.gmra.mrb[8].mxu0 %vm233_vm5, %v537_v48 }
 0x8ff   :  { %1411 = vmatpush3.bf16.msra.mxu0 %v1567_v16  ;;  %1331 = vmatprep.mubr.msk.f32.mxu0 %vm1491_vm0, %v1492_v19 }
 0x900   :  { %1412 = vmatprep.subr.bf16.mxu0 %v1490_v7 }
 0x903   :  { %1414 = vmatpush3.bf16.msra.mxu0 %v1570_v18 }
 0x904   :  { %1421 = vmatprep.subr.bf16.mxu0 %v1490_v7 }
 0x96f   :  { %v1681_v22 = vpop.f32.mrb[4].mxu0 }
 0x970   :  { %v210_v49 = vpop.f32.mrb[5].mxu0  ;;  %v216_v32 = vadd.f32 %v1681_v22, %v1603_v29 }
 0x971   :  { %v211_v8 = vadd.f32 %v1603_v29, %v210_v49 }
 0x973   :  { %v1683_v50 = vpop.f32.mrb[6].mxu0 }
 0x974   :  { %v1685_v51 = vpop.f32.mrb[7].mxu0 }
 0x975   :  { %v221_v22 = vadd.f32 %v1603_v29, %v1685_v51 }
 0x9d1   :  { %v606_v53 = vpop.f32.mrb[8].mxu0 }
 0x9d2   :  { %v610_v54 = vadd.f32 %v606_v53, %v206_v52  ;;  %v1311_v55 = vpop.f32.mrb[9].mxu0 }
 0x9d4   :  { %v1166_v56 = vmul.f32 -1.442695, %v610_v54 }
 0x9d6   :  { %1459 = vpow2.f32 %v1166_v56 }
 0x9e0   :  { %v1460_v57 = vpop.eup %1459 }
 0x9e1   :  { %v614_v58 = vadd.f32 1.0, %v1460_v57 }
 0x9e3   :  { %1461 = vrcp.f32 %v614_v58 }
 0x9ed   :  { %v1462_v59 = vpop.eup %1461 }
 0x9ee   :  { %v617_v60 = vmul.f32 2.0, %v1462_v59  ;;  %v619_v0 = vmul.f32 %v1462_v59, %v528_v34 }
 0x9f0   :  { %v1167_v61 = vadd.f32 -1.0, %v617_v60 }
 0x9f2   :  { %621 = vrot.lane.b32.xlu0 %v1167_v61, %s1493_s23 }
 0xa64   :  { %v622_v62 = vpop.permute.xlu0 %621 }
 0xa65   :  { %v624_v63 = vmul.f32 %v1462_v59, %v622_v62 }
 0xa67   :  { %626 = vrot.lane.b32.xlu1 %v624_v63, %s1494_s3 }
 0xad9   :  { %v627_v1 = vpop.permute.xlu1 %626 }
 0xada   :  { %v629_v2 = vadd.f32 %v627_v1, %v619_v0 }
 0xadc   :  { %1463 = vtanh.f32 %v629_v2 }
 0xae6   :  { %v1464_v3 = vpop.eup %1463 }
 0xae7   :  { %632 = vrot.lane.b32.xlu0 %v1464_v3, %s1493_s23 }
 0xb59   :  { %v633_v4 = vpop.permute.xlu0 %632 }
 0xb5a   :  { %v635_v5 = vmul.f32 %v1462_v59, %v633_v4  ;;  %v226_v4 = vadd.f32 %v1683_v50, %v1603_v29  ;;  %v1040_v50 = vld [vmem:[%s1766_s4] sm:$0xff] }
 0xb5c   :  { %637 = vrot.lane.b32.xlu1 %v635_v5, %s1494_s3 }
 0xbce   :  { %v638_v6 = vpop.permute.xlu1 %637 }
 0xbcf   :  { %1321 = vmatmul.mubr.msk.f32.vlgmr.msra.gmra.mrb[6].mxu1 %vm233_vm5, %v638_v6 }
 0xbd0   :  { %1417 = vmatpush3.bf16.msra.mxu1 %v1567_v16  ;;  %1342 = vmatprep.mubr.msk.f32.mxu1 %vm1491_vm0, %v1492_v19 }
 0xbd1   :  { %1418 = vmatprep.subr.bf16.mxu1 %v1490_v7 }
 0xbd4   :  { %1420 = vmatpush3.bf16.msra.mxu1 %v1570_v18 }
 0xbd5   :  { %1427 = vmatprep.subr.bf16.mxu1 %v1490_v7 }
 0xca2   :  { %v707_v9 = vpop.f32.mrb[6].mxu1 }
 0xca3   :  { %v711_v10 = vadd.f32 %v707_v9, %v211_v8  ;;  %v1322_v11 = vpop.f32.mrb[7].mxu1 }
 0xca5   :  { %v1169_v12 = vmul.f32 -1.442695, %v711_v10 }
 0xca7   :  { %1465 = vpow2.f32 %v1169_v12 }
 0xcb1   :  { %v1466_v13 = vpop.eup %1465 }
 0xcb2   :  { %v715_v14 = vadd.f32 1.0, %v1466_v13 }
 0xcb4   :  { %1467 = vrcp.f32 %v715_v14 }
 0xcbe   :  { %v1468_v15 = vpop.eup %1467 }
 0xcbf   :  { %v718_v17 = vmul.f32 2.0, %v1468_v15  ;;  %v720_v24 = vmul.f32 %v1468_v15, %v629_v2 }
 0xcc1   :  { %v1170_v20 = vadd.f32 -1.0, %v718_v17 }
 0xcc3   :  { %722 = vrot.lane.b32.xlu0 %v1170_v20, %s1493_s23 }
 0xd35   :  { %v723_v21 = vpop.permute.xlu0 %722 }
 0xd36   :  { %v725_v23 = vmul.f32 %v1468_v15, %v723_v21 }
 0xd38   :  { %727 = vrot.lane.b32.xlu1 %v725_v23, %s1494_s3  ;;  %v1041_v23 = vld [vmem:[%s1766_s4 + $0x8] sm:$0xff] }
 0xdaa   :  { %v728_v25 = vpop.permute.xlu1 %727 }
 0xdab   :  { %v730_v26 = vadd.f32 %v728_v25, %v720_v24  ;;  %v1042_v24 = vld [vmem:[%s1766_s4 + $0x10] sm:$0xff]  ;;  %v1428_v25 = vpack.c.bf16 %v1041_v23, %v1040_v50 }
 0xdad   :  { %1469 = vtanh.f32 %v730_v26 }
 0xdb7   :  { %v1470_v27 = vpop.eup %1469 }
 0xdb8   :  { %733 = vrot.lane.b32.xlu0 %v1470_v27, %s1493_s23 }
 0xe2a   :  { %v734_v28 = vpop.permute.xlu0 %733 }
 0xe2b   :  { %v736_v30 = vmul.f32 %v1468_v15, %v734_v28 }
 0xe2d   :  { %738 = vrot.lane.b32.xlu1 %v736_v30, %s1494_s3 }
 0xe9f   :  { %v739_v31 = vpop.permute.xlu1 %738 }
 0xea0   :  { %1332 = vmatmul.mubr.msk.f32.vlgmr.msra.gmra.mrb[10].mxu0 %vm233_vm5, %v739_v31 }
 0xea1   :  { %1423 = vmatpush3.bf16.msra.mxu0 %v1567_v16  ;;  %1353 = vmatprep.mubr.msk.f32.mxu0 %vm1491_vm0, %v1492_v19 }
 0xea2   :  { %1424 = vmatprep.subr.bf16.mxu0 %v1490_v7 }
 0xea5   :  { %1426 = vmatpush3.bf16.msra.mxu0 %v1570_v18 }
 0xf73   :  { %v808_v33 = vpop.f32.mrb[10].mxu0 }
 0xf74   :  { %v812_v34 = vadd.f32 %v808_v33, %v216_v32  ;;  %v1333_v35 = vpop.f32.mrb[11].mxu0 }
 0xf76   :  { %v1172_v36 = vmul.f32 -1.442695, %v812_v34 }
 0xf78   :  { %1471 = vpow2.f32 %v1172_v36 }
 0xf82   :  { %v1472_v37 = vpop.eup %1471 }
 0xf83   :  { %v816_v38 = vadd.f32 1.0, %v1472_v37 }
 0xf85   :  { %1473 = vrcp.f32 %v816_v38 }
 0xf8f   :  { %v1474_v39 = vpop.eup %1473 }
 0xf90   :  { %v819_v16 = vmul.f32 2.0, %v1474_v39  ;;  %v821_v18 = vmul.f32 %v1474_v39, %v730_v26  ;;  %v1043_v26 = vld [vmem:[%s1766_s4 + $0x18] sm:$0xff] }
 0xf91   :  { %v1431_v27 = vpack.c.bf16 %v1043_v26, %v1042_v24 }
 0xf92   :  { %v1173_v40 = vadd.f32 -1.0, %v819_v16 }
 0xf94   :  { %823 = vrot.lane.b32.xlu0 %v1173_v40, %s1493_s23 }
0x1006   :  { %v824_v41 = vpop.permute.xlu0 %823 }
0x1007   :  { %v826_v42 = vmul.f32 %v1474_v39, %v824_v41 }
0x1009   :  { %828 = vrot.lane.b32.xlu1 %v826_v42, %s1494_s3 }
0x107b   :  { %v829_v43 = vpop.permute.xlu1 %828 }
0x107c   :  { %v831_v44 = vadd.f32 %v829_v43, %v821_v18 }
0x107e   :  { %1475 = vtanh.f32 %v831_v44 }
0x1088   :  { %v1476_v45 = vpop.eup %1475 }
0x1089   :  { %834 = vrot.lane.b32.xlu0 %v1476_v45, %s1493_s23 }
0x10fb   :  { %v835_v46 = vpop.permute.xlu0 %834 }
0x10fc   :  { %v837_v47 = vmul.f32 %v1474_v39, %v835_v46 }
0x10fe   :  { %839 = vrot.lane.b32.xlu1 %v837_v47, %s1494_s3 }
0x1170   :  { %v840_v48 = vpop.permute.xlu1 %839 }
0x1171   :  { %1343 = vmatmul.mubr.msk.f32.vlgmr.msra.gmra.mrb[8].mxu1 %vm233_vm5, %v840_v48 }
0x1172   :  { %1364 = vmatprep.mubr.msk.f32.mxu1 %vm1491_vm0, %v1492_v19  ;;  %1429 = vmatpush3.bf16.msra.mxu1 %v1428_v25 }
0x1173   :  { %1430 = vmatprep.subr.bf16.mxu1 %v1490_v7  ;;  %v1180_v7 = vld [vmem:[%s1768_s5] ss:$0 sm:$0xff] }
0x1176   :  { %1432 = vmatpush3.bf16.msra.mxu1 %v1431_v27 }
0x1244   :  { %v909_v49 = vpop.f32.mrb[8].mxu1 }
0x1245   :  { %v913_v52 = vadd.f32 %v909_v49, %v221_v22  ;;  %v1344_v53 = vpop.f32.mrb[9].mxu1 }
0x1247   :  { %v1175_v54 = vmul.f32 -1.442695, %v913_v52 }
0x1249   :  { %1477 = vpow2.f32 %v1175_v54 }
0x1253   :  { %v1478_v55 = vpop.eup %1477 }
0x1254   :  { %v917_v56 = vadd.f32 1.0, %v1478_v55 }
0x1256   :  { %1479 = vrcp.f32 %v917_v56 }
0x1260   :  { %v1480_v57 = vpop.eup %1479 }
0x1261   :  { %v920_v58 = vmul.f32 2.0, %v1480_v57  ;;  %v922_v62 = vmul.f32 %v1480_v57, %v831_v44 }
0x1263   :  { %v1176_v59 = vadd.f32 -1.0, %v920_v58 }
0x1265   :  { %924 = vrot.lane.b32.xlu0 %v1176_v59, %s1493_s23 }
0x12d7   :  { %v925_v60 = vpop.permute.xlu0 %924 }
0x12d8   :  { %v927_v61 = vmul.f32 %v1480_v57, %v925_v60 }
0x12da   :  { %929 = vrot.lane.b32.xlu1 %v927_v61, %s1494_s3 }
0x134c   :  { %v930_v63 = vpop.permute.xlu1 %929 }
0x134d   :  { %v932_v51 = vadd.f32 %v930_v63, %v922_v62 }
0x134f   :  { %1481 = vtanh.f32 %v932_v51 }
0x1359   :  { %v1482_v0 = vpop.eup %1481 }
0x135a   :  { %935 = vrot.lane.b32.xlu0 %v1482_v0, %s1493_s23 }
0x13cc   :  { %v936_v1 = vpop.permute.xlu0 %935 }
0x13cd   :  { %v938_v2 = vmul.f32 %v1480_v57, %v936_v1 }
0x13cf   :  { %940 = vrot.lane.b32.xlu1 %v938_v2, %s1494_s3 }
0x1441   :  { %v941_v3 = vpop.permute.xlu1 %940 }
0x1442   :  { %1354 = vmatmul.mubr.msk.f32.vlgmr.msra.gmra.mrb[12].mxu0 %vm233_vm5, %v941_v3 }
0x1515   :  { %v1010_v5 = vpop.f32.mrb[12].mxu0 }
0x1516   :  { %v1014_v6 = vadd.f32 %v1010_v5, %v226_v4  ;;  %v1355_v8 = vpop.f32.mrb[13].mxu0 }
0x1518   :  { %v1178_v9 = vmul.f32 -1.442695, %v1014_v6 }
0x151a   :  { %1483 = vpow2.f32 %v1178_v9 }
0x1524   :  { %v1484_v10 = vpop.eup %1483 }
0x1525   :  { %v1018_v11 = vadd.f32 1.0, %v1484_v10 }
0x1527   :  { %1485 = vrcp.f32 %v1018_v11 }
0x1531   :  { %v1486_v12 = vpop.eup %1485 }
0x1532   :  { %v1021_v13 = vmul.f32 2.0, %v1486_v12  ;;  %v1023_v20 = vmul.f32 %v1486_v12, %v932_v51 }
0x1534   :  { %v1179_v14 = vadd.f32 -1.0, %v1021_v13 }
0x1536   :  { %1025 = vrot.lane.b32.xlu0 %v1179_v14, %s1493_s23 }
0x15a8   :  { %v1026_v15 = vpop.permute.xlu0 %1025 }
0x15a9   :  { %v1028_v17 = vmul.f32 %v1486_v12, %v1026_v15 }
0x15ab   :  { %1030 = vrot.lane.b32.xlu1 %v1028_v17, %s1494_s3 }
0x161d   :  { %v1031_v21 = vpop.permute.xlu1 %1030 }
0x161e   :  { %v1033_v29 = vadd.f32 %v1031_v21, %v1023_v20 }
0x1620   :  { %1487 = vtanh.f32 %v1033_v29 }
0x162a   :  { %v1488_v28 = vpop.eup %1487 }
0x162b   :  { %1036 = vrot.lane.b32.xlu0 %v1488_v28, %s1493_s23 }
0x169d   :  { %v1037_v30 = vpop.permute.xlu0 %1036 }
0x169e   :  { %v1039_v31 = vmul.f32 %v1486_v12, %v1037_v30 }
0x16a0   :  { %1052 = vrot.lane.b32.xlu1 %v1039_v31, %s1494_s3 }
0x1712   :  { %v1053_v32 = vpop.permute.xlu1 %1052 }
0x1713   :  { %1128 = vst.msk [vmem:[%s1767_s6] sm:$0xff] %vm233_vm5, %v1053_v32  ;;  %1365 = vmatmul.mubr.msk.f32.vlgmr.msra.gmra.mrb[10].mxu1 %vm233_vm5, %v1053_v32 }
0x17e6   :  { %v1122_v19 = vpop.f32.mrb[10].mxu1 }
0x17e7   :  { %v1123_v33 = vadd.f32 %v1180_v7, %v1122_v19  ;;  %v1366_v34 = vpop.f32.mrb[11].mxu1 }
0x17e9   :  { %1130 = vrot.lane.b32.xlu0 %v1123_v33, %s1494_s3 }
0x185b   :  { %v1131_v35 = vpop.permute.xlu0 %1130 }
0x185c   :  { %1134 = vst.msk [vmem:[%s1767_s6] sm:$0xff] %vm1133_vm12, %v1131_v35 }

</bundles_post_ra>
